<compile_context>
chip_gen: v6e
topology: v6e:2x2x1
jax: 0.10.0
libtpu: 0.0.40
codegen_flags: <defaults>
</compile_context>

<pallas_src>
import jax
import jax.numpy as jnp
from jax import lax
from jax.experimental import pallas as pl
from jax.experimental.pallas import tpu as pltpu


def _interp_matrix_x2(out_size: int, in_size: int) -> jnp.ndarray:
    """1-D PyTorch bilinear weights, scale_factor=2, align_corners=False."""
    i = jnp.arange(out_size, dtype=jnp.float32)
    src = jnp.maximum((i + 0.5) / 2.0 - 0.5, 0.0)
    i0 = jnp.floor(src).astype(jnp.int32)
    frac = src - i0.astype(jnp.float32)
    i1 = jnp.minimum(i0 + 1, in_size - 1)
    rows = jnp.arange(out_size)
    U = jnp.zeros((out_size, in_size), jnp.float32)
    U = U.at[rows, i0].add(1.0 - frac)
    U = U.at[rows, i1].add(frac)
    return U


def _pick_row_tile(Ho, Wo, C, in_esize, cur_esize, out_esize, budget_bytes):
    """Largest even row tile whose double-buffered working set fits the budget."""
    def footprint(t):
        blk = (t * Wo * 4 * C * in_esize          # packed shallow phases
               + Wo * 4 * C * in_esize            # shallow halo row
               + t * Wo * C * cur_esize           # current (residual)
               + (t // 2 + 2) * Wo * C * 4        # deep tile + 2 halo rows (f32)
               + t * Wo * C * out_esize           # output tile
               + 9 * C * C * in_esize + 4 * C)    # folded conv weights + bias
        return 2 * blk                            # double-buffered pipeline
    t_max = 2
    for cand in range(2, Ho + 1, 2):
        if footprint(cand) <= budget_bytes:
            t_max = cand
    # Prefer an even divisor of Ho (no padded tail) unless it is much smaller
    # than what the budget allows; otherwise pad Ho (handled by the caller).
    t_div = 2
    for cand in range(2, t_max + 1, 2):
        if Ho % cand == 0:
            t_div = cand
    if 2 * t_div >= t_max or t_div >= 64:
        return t_div
    # Awkward Ho: pick the smallest near-t_max tile that minimizes tail padding.
    n_tiles = -(-Ho // t_max)
    t = -(-Ho // n_tiles)
    return t + (t % 2)


def fuse_kernel(xp_ref, halo_ref, cur_ref, dcur_ref, dpre_ref, dnxt_ref,
                wa_ref, wb_ref, wc_ref, b_ref, out_ref):
    _, t, wo, c4 = xp_ref.shape          # packed block = (1, T, Wo, 4C)
    c = c4 // 4
    r = pl.program_id(1)

    xp = xp_ref[0]                       # (T, Wo, 4C) : [ee | eo | oe | oo]

    # ---- group A: the four unshifted conv taps straight off the packed block -
    acc = jnp.dot(xp.reshape(t * wo, 4 * c), wa_ref[...],
                  preferred_element_type=jnp.float32)              # (T*Wo, C)

    # ---- group B: row-up-shifted taps (xoe_up, xoo_up) -----------------------
    # Output row r*T needs shallow row 2*r*T - 1 (last odd row of the previous
    # tile).  Tile 0 sees the conv zero padding instead -> gate halo to zero.
    odd_rows = xp[:, :, 2 * c:]                                    # (T, Wo, 2C)
    gate = (r > 0).astype(xp.dtype)
    prev = halo_ref[0][:, :, 2 * c:] * gate                        # (1, Wo, 2C)
    up_pair = jnp.concatenate([prev, odd_rows[:-1]], axis=0)       # (T, Wo, 2C)
    acc += jnp.dot(up_pair.reshape(t * wo, 2 * c), wb_ref[...],
                   preferred_element_type=jnp.float32)

    # ---- group C: the three column-left-shifted taps, shifted once -----------
    cat = jnp.concatenate([xp[:, :, c:2 * c],                      # xeo
                           xp[:, :, 3 * c:],                       # xoo
                           up_pair[:, :, c:]], axis=-1)            # xoo_up
    sw = jnp.concatenate([jnp.zeros_like(cat[:, :1]), cat[:, :-1]],
                         axis=1)                                   # x[:, j-1], 0 at j==0
    acc += jnp.dot(sw.reshape(t * wo, 3 * c), wc_ref[...],
                   preferred_element_type=jnp.float32)

    conv = jnp.maximum(acc + b_ref[...], 0.0).reshape(t, wo, c)    # folded BN + ReLU

    # ---- bilinear x2 along H on the (already W-upsampled) deep tile ----------
    #   out[2i]   = 0.75*d[i] + 0.25*d[max(i-1, 0)]
    #   out[2i+1] = 0.75*d[i] + 0.25*d[min(i+1, Hd-1)]
    # (the two halo refs are already the clamped rows, courtesy of the index_map)
    nr = t // 2
    d_cur = dcur_ref[0].astype(jnp.float32)                        # (nr, Wo, C)
    d_pre = dpre_ref[0].astype(jnp.float32)                        # d[i0-1] clamped
    d_nxt = dnxt_ref[0].astype(jnp.float32)                        # d[i0+nr] clamped
    if nr > 1:
        d_pre = jnp.concatenate([d_pre, d_cur[:-1]], axis=0)
        d_nxt = jnp.concatenate([d_cur[1:], d_nxt], axis=0)
    even = 0.75 * d_cur + 0.25 * d_pre
    odd = 0.75 * d_cur + 0.25 * d_nxt
    up = jnp.stack([even, odd], axis=1).reshape(t, wo, c)

    out_ref[0] = (conv + cur_ref[0].astype(jnp.float32) + up).astype(out_ref.dtype)


def fuse_forward(shallow, current, deep, conv_w, bn_gamma, bn_beta, bn_mean,
                 bn_var, eps=1e-5, compute_dtype=jnp.bfloat16, row_tile=None):
    N, C, H, W = shallow.shape
    assert H % 2 == 0 and W % 2 == 0, "need even H, W"
    Ho, Wo = H // 2, W // 2
    Hd, Wd = deep.shape[2], deep.shape[3]
    assert current.shape == (N, C, Ho, Wo)
    assert (2 * Hd, 2 * Wd) == (Ho, Wo)
    out_dtype = shallow.dtype

    # --- glue: one fused transpose per tensor ---------------------------------
    # shallow NCHW -> packed space-to-depth (N, Ho, Wo, 4C), lanes = [ee|eo|oe|oo]
    xpack = (shallow.reshape(N, C, Ho, 2, Wo, 2)
                    .transpose(0, 2, 4, 3, 5, 1)
                    .reshape(N, Ho, Wo, 4 * C)
                    .astype(compute_dtype))
    cur = jnp.transpose(current, (0, 2, 3, 1))         # residual kept in its own dtype
    # separable bilinear x2: W direction applied here on the tiny deep tensor
    Uw = _interp_matrix_x2(Wo, Wd)                                     # (Wo, Wd)
    dwup = jnp.einsum('ow,nchw->nhoc', Uw, deep.astype(jnp.float32))   # (N, Hd, Wo, C)

    # --- fold eval-mode BatchNorm into the grouped conv-tap matrices ----------
    scale = bn_gamma / jnp.sqrt(bn_var + eps)                          # (C,)
    w_io = jnp.transpose(conv_w, (2, 3, 1, 0)) * scale                 # (3,3,Ci,Co)
    w_a = jnp.concatenate([w_io[1, 1], w_io[1, 2], w_io[2, 1], w_io[2, 2]],
                          axis=0).astype(compute_dtype)                # (4C, C)
    w_b = jnp.concatenate([w_io[0, 1], w_io[0, 2]],
                          axis=0).astype(compute_dtype)                # (2C, C)
    w_c = jnp.concatenate([w_io[1, 0], w_io[2, 0], w_io[0, 0]],
                          axis=0).astype(compute_dtype)                # (3C, C)
    bias = (bn_beta - bn_mean * scale).reshape(1, C).astype(jnp.float32)

    # --- per-chip VMEM budget and row tile -------------------------------------
    try:
        vmem_cap = int(pltpu.get_tpu_info().vmem_capacity_bytes)
    except Exception:
        vmem_cap = 64 * 1024 * 1024                    # v7x-conservative fallback
    vmem_limit = max(min(vmem_cap - 16 * 1024 * 1024, 96 * 1024 * 1024),
                     32 * 1024 * 1024)
    budget = max(vmem_limit - 8 * 1024 * 1024, 16 * 1024 * 1024)

    in_esize = jnp.dtype(compute_dtype).itemsize
    cur_esize = jnp.dtype(cur.dtype).itemsize
    out_esize = jnp.dtype(out_dtype).itemsize
    if row_tile is None:
        T = _pick_row_tile(Ho, Wo, C, in_esize, cur_esize, out_esize, budget)
    else:
        assert row_tile >= 2 and row_tile % 2 == 0
        T = min(row_tile, Ho)
    HoP = -(-Ho // T) * T
    if HoP != Ho:
        # pad awkward Ho up to a multiple of T; padded rows are sliced off below.
        HdP = HoP // 2
        xpack = jnp.pad(xpack, ((0, 0), (0, HoP - Ho), (0, 0), (0, 0)))
        cur = jnp.pad(cur, ((0, 0), (0, HoP - Ho), (0, 0), (0, 0)))
        dwup = jnp.pad(dwup, ((0, 0), (0, HdP - Hd), (0, 0), (0, 0)), mode='edge')
    nh = T // 2
    grid = (N, HoP // T)

    out_nhwc = pl.pallas_call(
        fuse_kernel,
        out_shape=jax.ShapeDtypeStruct((N, HoP, Wo, C), out_dtype),
        grid_spec=pltpu.PrefetchScalarGridSpec(
            num_scalar_prefetch=0,
            grid=grid,
            in_specs=[
                # packed shallow phases + clamped 1-row halo (previous odd row)
                pl.BlockSpec((1, T, Wo, 4 * C), lambda n, r: (n, r, 0, 0)),
                pl.BlockSpec((1, 1, Wo, 4 * C),
                             lambda n, r: (n, jnp.maximum(r * T - 1, 0), 0, 0)),
                # residual
                pl.BlockSpec((1, T, Wo, C), lambda n, r: (n, r, 0, 0)),
                # deep (W-upsampled) tile + clamped prev/next halo rows
                pl.BlockSpec((1, nh, Wo, C), lambda n, r: (n, r, 0, 0)),
                pl.BlockSpec((1, 1, Wo, C),
                             lambda n, r: (n, jnp.maximum(r * nh - 1, 0), 0, 0)),
                pl.BlockSpec((1, 1, Wo, C),
                             lambda n, r: (n, jnp.minimum(r * nh + nh, Hd - 1), 0, 0)),
                # folded conv weights (grouped) + BN bias (constant block index)
                pl.BlockSpec((4 * C, C), lambda n, r: (0, 0)),
                pl.BlockSpec((2 * C, C), lambda n, r: (0, 0)),
                pl.BlockSpec((3 * C, C), lambda n, r: (0, 0)),
                pl.BlockSpec((1, C), lambda n, r: (0, 0)),
            ],
            out_specs=pl.BlockSpec((1, T, Wo, C), lambda n, r: (n, r, 0, 0)),
        ),
        compiler_params=pltpu.CompilerParams(
            # both axes independent -> v7x 2-TC sharding; default double-buffering
            # (pl.Buffered(3) only as a measured sweep if DMA shows up exposed).
            dimension_semantics=("parallel", "parallel"),
            vmem_limit_bytes=vmem_limit),
    )(xpack, xpack, cur, dwup, dwup, dwup, w_a, w_b, w_c, bias)

    out_nhwc = out_nhwc[:, :Ho]
    return jnp.transpose(out_nhwc, (0, 3, 1, 2))


def fuse_reference(shallow, current, deep, conv_w, bn_gamma, bn_beta, bn_mean,
                   bn_var, eps=1e-5):
    """Pure-JAX reference (independent conv/interp path) for correctness checks."""
    conv = lax.conv_general_dilated(
        shallow, conv_w, window_strides=(2, 2), padding=((1, 1), (1, 1)),
        dimension_numbers=('NCHW', 'OIHW', 'NCHW'))
    scale = bn_gamma / jnp.sqrt(bn_var + eps)
    conv = conv * scale[None, :, None, None] + (bn_beta - bn_mean * scale)[None, :, None, None]
    conv = jnp.maximum(conv, 0.0)
    _, _, Hd, Wd = deep.shape
    Uh = _interp_matrix_x2(2 * Hd, Hd)
    Uw = _interp_matrix_x2(2 * Wd, Wd)
    up = jnp.einsum('ip,ncpq,jq->ncij', Uh, deep, Uw)
    return conv + current + up


if __name__ == "__main__":
    key = jax.random.PRNGKey(0)
    N, C, H, W = 2, 8, 16, 16          # align_channels = 8 (smoke-test size)
    ks = jax.random.split(key, 8)
    shallow = jax.random.normal(ks[0], (N, C, H, W), jnp.float32)
    current = jax.random.normal(ks[1], (N, C, H // 2, W // 2), jnp.float32)
    deep = jax.random.normal(ks[2], (N, C, H // 4, W // 4), jnp.float32)

    conv_w = 0.1 * jax.random.normal(ks[3], (C, C, 3, 3), jnp.float32)     # OIHW
    bn_gamma = 1.0 + 0.1 * jax.random.normal(ks[4], (C,), jnp.float32)
    bn_beta = 0.1 * jax.random.normal(ks[5], (C,), jnp.float32)
    bn_mean = 0.05 * jax.random.normal(ks[6], (C,), jnp.float32)
    bn_var = jax.random.uniform(ks[7], (C,), jnp.float32, minval=0.5, maxval=1.5)

    ref = fuse_reference(shallow, current, deep, conv_w, bn_gamma, bn_beta,
                         bn_mean, bn_var)

    # Exact path: f32 MXU operands, auto row tile (single tile here).
    out_f32 = jax.block_until_ready(
        fuse_forward(shallow, current, deep, conv_w, bn_gamma, bn_beta, bn_mean,
                     bn_var, compute_dtype=jnp.float32))
    assert out_f32.shape == (N, C, H // 2, W // 2)
    err = float(jnp.max(jnp.abs(out_f32 - ref)))
    assert err < 1e-4, f"f32 max err {err}"

    # Multi-tile path: forced 2-row tiles exercise the shallow/deep halo specs.
    out_tiled = jax.block_until_ready(
        fuse_forward(shallow, current, deep, conv_w, bn_gamma, bn_beta, bn_mean,
                     bn_var, compute_dtype=jnp.float32, row_tile=2))
    err_t = float(jnp.max(jnp.abs(out_tiled - ref)))
    assert err_t < 1e-4, f"tiled f32 max err {err_t}"

    # Fast path: bf16 MXU operands, f32 accumulation and f32 residual path.
    out_bf16 = jax.block_until_ready(
        fuse_forward(shallow, current, deep, conv_w, bn_gamma, bn_beta, bn_mean,
                     bn_var, compute_dtype=jnp.bfloat16))
    err16 = float(jnp.max(jnp.abs(out_bf16 - ref)))
    assert err16 < 0.1, f"bf16 max err {err16}"

    # Awkward Ho (= 12) with a forced 8-row tile exercises the padded-tail path.
    H2 = 24
    shallow2 = jax.random.normal(ks[0], (N, C, H2, W), jnp.float32)
    current2 = jax.random.normal(ks[1], (N, C, H2 // 2, W // 2), jnp.float32)
    deep2 = jax.random.normal(ks[2], (N, C, H2 // 4, W // 4), jnp.float32)
    ref2 = fuse_reference(shallow2, current2, deep2, conv_w, bn_gamma, bn_beta,
                          bn_mean, bn_var)
    out2 = jax.block_until_ready(
        fuse_forward(shallow2, current2, deep2, conv_w, bn_gamma, bn_beta,
                     bn_mean, bn_var, compute_dtype=jnp.float32, row_tile=8))
    err2 = float(jnp.max(jnp.abs(out2 - ref2)))
    assert err2 < 1e-4, f"padded-tail f32 max err {err2}"

    print("KERNEL_OK")
</pallas_src>

<mosaic_0001>
module attributes {stable_mosaic.version = 11 : i64} {
  func.func @fuse_kernel(%arg0: i32, %arg1: i32, %arg2: memref<1x8x8x32xf32, #tpu.memory_space<vmem>>, %arg3: memref<1x1x8x32xf32, #tpu.memory_space<vmem>>, %arg4: memref<1x8x8x8xf32, #tpu.memory_space<vmem>>, %arg5: memref<1x4x8x8xf32, #tpu.memory_space<vmem>>, %arg6: memref<1x1x8x8xf32, #tpu.memory_space<vmem>>, %arg7: memref<1x1x8x8xf32, #tpu.memory_space<vmem>>, %arg8: memref<32x8xf32, #tpu.memory_space<vmem>>, %arg9: memref<16x8xf32, #tpu.memory_space<vmem>>, %arg10: memref<24x8xf32, #tpu.memory_space<vmem>>, %arg11: memref<1x8xf32, #tpu.memory_space<vmem>>, %arg12: memref<1x8x8x8xf32, #tpu.memory_space<vmem>>) attributes {dimension_semantics = [#tpu.dimension_semantics<parallel>, #tpu.dimension_semantics<parallel>], iteration_bounds = array<i64: 2, 1>, scalar_prefetch = 0 : i64, scratch_operands = 0 : i64, tpu.core_type = #tpu.core_type<tc>, window_params = [{transform_indices = @transform_0, window_bounds = array<i64: 1, 8, 8, 32>}, {transform_indices = @transform_1, window_bounds = array<i64: 1, 1, 8, 32>}, {transform_indices = @transform_2, window_bounds = array<i64: 1, 8, 8, 8>}, {transform_indices = @transform_3, window_bounds = array<i64: 1, 4, 8, 8>}, {transform_indices = @transform_4, window_bounds = array<i64: 1, 1, 8, 8>}, {transform_indices = @transform_5, window_bounds = array<i64: 1, 1, 8, 8>}, {pipeline_mode = #tpu.pipeline_mode<synchronous>, transform_indices = @transform_6, window_bounds = array<i64: 32, 8>}, {pipeline_mode = #tpu.pipeline_mode<synchronous>, transform_indices = @transform_7, window_bounds = array<i64: 16, 8>}, {pipeline_mode = #tpu.pipeline_mode<synchronous>, transform_indices = @transform_8, window_bounds = array<i64: 24, 8>}, {pipeline_mode = #tpu.pipeline_mode<synchronous>, transform_indices = @transform_9, window_bounds = array<i64: 1, 8>}, {transform_indices = @transform_10, window_bounds = array<i64: 1, 8, 8, 8>}]} {
    %c0 = arith.constant 0 : index
    %c0_0 = arith.constant 0 : index
    %c0_1 = arith.constant 0 : index
    %c0_2 = arith.constant 0 : index
    %0 = vector.load %arg2[%c0, %c0_0, %c0_1, %c0_2] : memref<1x8x8x32xf32, #tpu.memory_space<vmem>>, vector<1x8x8x32xf32>
    %1 = vector.shape_cast %0 : vector<1x8x8x32xf32> to vector<8x8x32xf32>
    %2 = vector.shape_cast %1 : vector<8x8x32xf32> to vector<64x32xf32>
    %c0_3 = arith.constant 0 : index
    %c0_4 = arith.constant 0 : index
    %3 = vector.load %arg8[%c0_3, %c0_4] : memref<32x8xf32, #tpu.memory_space<vmem>>, vector<32x8xf32>
    %cst = arith.constant dense<0.000000e+00> : vector<64x8xf32>
    %4 = tpu.matmul %2, %3, %cst {dimension_numbers = #tpu.dot_dimension_numbers<[1], [0], [0], [1], [0, 0, 1, 1], [], []>} : vector<64x32xf32>, vector<32x8xf32>, vector<64x8xf32> -> vector<64x8xf32>
    %5 = vector.extract_strided_slice %1 {offsets = [0, 0, 16], sizes = [8, 8, 16], strides = [1, 1, 1]} : vector<8x8x32xf32> to vector<8x8x16xf32>
    %c0_i32 = arith.constant 0 : i32
    %6 = arith.cmpi sgt, %arg1, %c0_i32 : i32
    %7 = arith.extui %6 : i1 to i32
    %8 = arith.sitofp %7 : i32 to f32
    %c0_5 = arith.constant 0 : index
    %c0_6 = arith.constant 0 : index
    %c0_7 = arith.constant 0 : index
    %c0_8 = arith.constant 0 : index
    %9 = vector.load %arg3[%c0_5, %c0_6, %c0_7, %c0_8] : memref<1x1x8x32xf32, #tpu.memory_space<vmem>>, vector<1x1x8x32xf32>
    %10 = vector.shape_cast %9 : vector<1x1x8x32xf32> to vector<1x8x32xf32>
    %11 = vector.extract_strided_slice %10 {offsets = [0, 0, 16], sizes = [1, 8, 16], strides = [1, 1, 1]} : vector<1x8x32xf32> to vector<1x8x16xf32>
    %12 = vector.broadcast %8 : f32 to vector<1x8x16xf32>
    %13 = arith.mulf %11, %12 : vector<1x8x16xf32>
    %14 = vector.extract_strided_slice %5 {offsets = [0, 0, 0], sizes = [7, 8, 16], strides = [1, 1, 1]} : vector<8x8x16xf32> to vector<7x8x16xf32>
    %15 = tpu.concatenate %13, %14 in 0 : vector<1x8x16xf32>, vector<7x8x16xf32> -> vector<8x8x16xf32>
    %16 = vector.shape_cast %15 : vector<8x8x16xf32> to vector<64x16xf32>
    %c0_9 = arith.constant 0 : index
    %c0_10 = arith.constant 0 : index
    %17 = vector.load %arg9[%c0_9, %c0_10] : memref<16x8xf32, #tpu.memory_space<vmem>>, vector<16x8xf32>
    %cst_11 = arith.constant dense<0.000000e+00> : vector<64x8xf32>
    %18 = tpu.matmul %16, %17, %cst_11 {dimension_numbers = #tpu.dot_dimension_numbers<[1], [0], [0], [1], [0, 0, 1, 1], [], []>} : vector<64x16xf32>, vector<16x8xf32>, vector<64x8xf32> -> vector<64x8xf32>
    %19 = arith.addf %4, %18 : vector<64x8xf32>
    %20 = vector.extract_strided_slice %1 {offsets = [0, 0, 8], sizes = [8, 8, 8], strides = [1, 1, 1]} : vector<8x8x32xf32> to vector<8x8x8xf32>
    %21 = vector.extract_strided_slice %1 {offsets = [0, 0, 24], sizes = [8, 8, 8], strides = [1, 1, 1]} : vector<8x8x32xf32> to vector<8x8x8xf32>
    %22 = vector.extract_strided_slice %15 {offsets = [0, 0, 8], sizes = [8, 8, 8], strides = [1, 1, 1]} : vector<8x8x16xf32> to vector<8x8x8xf32>
    %23 = tpu.concatenate %20, %21, %22 in 2 : vector<8x8x8xf32>, vector<8x8x8xf32>, vector<8x8x8xf32> -> vector<8x8x24xf32>
    %cst_12 = arith.constant 0.000000e+00 : f32
    %24 = vector.broadcast %cst_12 : f32 to vector<8x1x24xf32>
    %25 = vector.extract_strided_slice %23 {offsets = [0, 0, 0], sizes = [8, 7, 24], strides = [1, 1, 1]} : vector<8x8x24xf32> to vector<8x7x24xf32>
    %26 = tpu.concatenate %24, %25 in 1 : vector<8x1x24xf32>, vector<8x7x24xf32> -> vector<8x8x24xf32>
    %27 = vector.shape_cast %26 : vector<8x8x24xf32> to vector<64x24xf32>
    %c0_13 = arith.constant 0 : index
    %c0_14 = arith.constant 0 : index
    %28 = vector.load %arg10[%c0_13, %c0_14] : memref<24x8xf32, #tpu.memory_space<vmem>>, vector<24x8xf32>
    %cst_15 = arith.constant dense<0.000000e+00> : vector<64x8xf32>
    %29 = tpu.matmul %27, %28, %cst_15 {dimension_numbers = #tpu.dot_dimension_numbers<[1], [0], [0], [1], [0, 0, 1, 1], [], []>} : vector<64x24xf32>, vector<24x8xf32>, vector<64x8xf32> -> vector<64x8xf32>
    %30 = arith.addf %19, %29 : vector<64x8xf32>
    %c0_16 = arith.constant 0 : index
    %c0_17 = arith.constant 0 : index
    %31 = vector.load %arg11[%c0_16, %c0_17] : memref<1x8xf32, #tpu.memory_space<vmem>>, vector<1x8xf32>
    %32 = vector.broadcast %31 : vector<1x8xf32> to vector<64x8xf32>
    %33 = arith.addf %30, %32 : vector<64x8xf32>
    %cst_18 = arith.constant 0.000000e+00 : f32
    %34 = vector.broadcast %cst_18 : f32 to vector<64x8xf32>
    %35 = arith.maximumf %33, %34 : vector<64x8xf32>
    %36 = vector.shape_cast %35 : vector<64x8xf32> to vector<8x8x8xf32>
    %c0_19 = arith.constant 0 : index
    %c0_20 = arith.constant 0 : index
    %c0_21 = arith.constant 0 : index
    %c0_22 = arith.constant 0 : index
    %37 = vector.load %arg5[%c0_19, %c0_20, %c0_21, %c0_22] : memref<1x4x8x8xf32, #tpu.memory_space<vmem>>, vector<1x4x8x8xf32>
    %38 = vector.shape_cast %37 : vector<1x4x8x8xf32> to vector<4x8x8xf32>
    %c0_23 = arith.constant 0 : index
    %c0_24 = arith.constant 0 : index
    %c0_25 = arith.constant 0 : index
    %c0_26 = arith.constant 0 : index
    %39 = vector.load %arg6[%c0_23, %c0_24, %c0_25, %c0_26] : memref<1x1x8x8xf32, #tpu.memory_space<vmem>>, vector<1x1x8x8xf32>
    %40 = vector.shape_cast %39 : vector<1x1x8x8xf32> to vector<1x8x8xf32>
    %c0_27 = arith.constant 0 : index
    %c0_28 = arith.constant 0 : index
    %c0_29 = arith.constant 0 : index
    %c0_30 = arith.constant 0 : index
    %41 = vector.load %arg7[%c0_27, %c0_28, %c0_29, %c0_30] : memref<1x1x8x8xf32, #tpu.memory_space<vmem>>, vector<1x1x8x8xf32>
    %42 = vector.shape_cast %41 : vector<1x1x8x8xf32> to vector<1x8x8xf32>
    %43 = vector.extract_strided_slice %38 {offsets = [0, 0, 0], sizes = [3, 8, 8], strides = [1, 1, 1]} : vector<4x8x8xf32> to vector<3x8x8xf32>
    %44 = tpu.concatenate %40, %43 in 0 : vector<1x8x8xf32>, vector<3x8x8xf32> -> vector<4x8x8xf32>
    %45 = vector.extract_strided_slice %38 {offsets = [1, 0, 0], sizes = [3, 8, 8], strides = [1, 1, 1]} : vector<4x8x8xf32> to vector<3x8x8xf32>
    %46 = tpu.concatenate %45, %42 in 0 : vector<3x8x8xf32>, vector<1x8x8xf32> -> vector<4x8x8xf32>
    %cst_31 = arith.constant 7.500000e-01 : f32
    %47 = vector.broadcast %cst_31 : f32 to vector<4x8x8xf32>
    %48 = arith.mulf %47, %38 : vector<4x8x8xf32>
    %cst_32 = arith.constant 2.500000e-01 : f32
    %49 = vector.broadcast %cst_32 : f32 to vector<4x8x8xf32>
    %50 = arith.mulf %49, %44 : vector<4x8x8xf32>
    %51 = arith.addf %48, %50 : vector<4x8x8xf32>
    %cst_33 = arith.constant 7.500000e-01 : f32
    %52 = vector.broadcast %cst_33 : f32 to vector<4x8x8xf32>
    %53 = arith.mulf %52, %38 : vector<4x8x8xf32>
    %cst_34 = arith.constant 2.500000e-01 : f32
    %54 = vector.broadcast %cst_34 : f32 to vector<4x8x8xf32>
    %55 = arith.mulf %54, %46 : vector<4x8x8xf32>
    %56 = arith.addf %53, %55 : vector<4x8x8xf32>
    %57 = vector.shape_cast %51 : vector<4x8x8xf32> to vector<4x1x8x8xf32>
    %58 = vector.shape_cast %56 : vector<4x8x8xf32> to vector<4x1x8x8xf32>
    %59 = tpu.concatenate %57, %58 in 1 : vector<4x1x8x8xf32>, vector<4x1x8x8xf32> -> vector<4x2x8x8xf32>
    %60 = vector.shape_cast %59 : vector<4x2x8x8xf32> to vector<8x8x8xf32>
    %c0_35 = arith.constant 0 : index
    %c0_36 = arith.constant 0 : index
    %c0_37 = arith.constant 0 : index
    %c0_38 = arith.constant 0 : index
    %61 = vector.load %arg4[%c0_35, %c0_36, %c0_37, %c0_38] : memref<1x8x8x8xf32, #tpu.memory_space<vmem>>, vector<1x8x8x8xf32>
    %62 = vector.shape_cast %61 : vector<1x8x8x8xf32> to vector<8x8x8xf32>
    %63 = arith.addf %36, %62 : vector<8x8x8xf32>
    %64 = arith.addf %63, %60 : vector<8x8x8xf32>
    %c0_39 = arith.constant 0 : index
    %c0_40 = arith.constant 0 : index
    %c0_41 = arith.constant 0 : index
    %c0_42 = arith.constant 0 : index
    %65 = vector.load %arg12[%c0_39, %c0_40, %c0_41, %c0_42] : memref<1x8x8x8xf32, #tpu.memory_space<vmem>>, vector<1x8x8x8xf32>
    %66 = vector.shape_cast %65 : vector<1x8x8x8xf32> to vector<8x8x8xf32>
    %67 = vector.shape_cast %64 : vector<8x8x8xf32> to vector<1x8x8x8xf32>
    tpu.vector_store %arg12[%c0_39, %c0_40, %c0_41, %c0_42], %67 {strides = array<i32>} : memref<1x8x8x8xf32, #tpu.memory_space<vmem>>, vector<1x8x8x8xf32>,
    return
  }
  func.func @transform_0(%arg0: i32, %arg1: i32) -> (i32, i32, i32, i32) {
    %c0_i32 = arith.constant 0 : i32
    %c0_i32_0 = arith.constant 0 : i32
    %c0_i32_1 = arith.constant 0 : i32
    return %arg0, %arg1, %c0_i32, %c0_i32_0 : i32, i32, i32, i32
  }
  func.func @transform_1(%arg0: i32, %arg1: i32) -> (i32, i32, i32, i32) {
    %c8_i32 = arith.constant 8 : i32
    %0 = arith.muli %arg1, %c8_i32 : i32
    %c1_i32 = arith.constant 1 : i32
    %1 = arith.subi %0, %c1_i32 : i32
    %c0_i32 = arith.constant 0 : i32
    %2 = arith.maxsi %1, %c0_i32 : i32
    %c0_i32_0 = arith.constant 0 : i32
    %c0_i32_1 = arith.constant 0 : i32
    %c0_i32_2 = arith.constant 0 : i32
    return %arg0, %2, %c0_i32_0, %c0_i32_1 : i32, i32, i32, i32
  }
  func.func @transform_2(%arg0: i32, %arg1: i32) -> (i32, i32, i32, i32) {
    %c0_i32 = arith.constant 0 : i32
    %c0_i32_0 = arith.constant 0 : i32
    %c0_i32_1 = arith.constant 0 : i32
    return %arg0, %arg1, %c0_i32, %c0_i32_0 : i32, i32, i32, i32
  }
  func.func @transform_3(%arg0: i32, %arg1: i32) -> (i32, i32, i32, i32) {
    %c0_i32 = arith.constant 0 : i32
    %c0_i32_0 = arith.constant 0 : i32
    %c0_i32_1 = arith.constant 0 : i32
    return %arg0, %arg1, %c0_i32, %c0_i32_0 : i32, i32, i32, i32
  }
  func.func @transform_4(%arg0: i32, %arg1: i32) -> (i32, i32, i32, i32) {
    %c4_i32 = arith.constant 4 : i32
    %0 = arith.muli %arg1, %c4_i32 : i32
    %c1_i32 = arith.constant 1 : i32
    %1 = arith.subi %0, %c1_i32 : i32
    %c0_i32 = arith.constant 0 : i32
    %2 = arith.maxsi %1, %c0_i32 : i32
    %c0_i32_0 = arith.constant 0 : i32
    %c0_i32_1 = arith.constant 0 : i32
    %c0_i32_2 = arith.constant 0 : i32
    return %arg0, %2, %c0_i32_0, %c0_i32_1 : i32, i32, i32, i32
  }
  func.func @transform_5(%arg0: i32, %arg1: i32) -> (i32, i32, i32, i32) {
    %c4_i32 = arith.constant 4 : i32
    %0 = arith.muli %arg1, %c4_i32 : i32
    %c4_i32_0 = arith.constant 4 : i32
    %1 = arith.addi %0, %c4_i32_0 : i32
    %c3_i32 = arith.constant 3 : i32
    %2 = arith.minsi %1, %c3_i32 : i32
    %c0_i32 = arith.constant 0 : i32
    %c0_i32_1 = arith.constant 0 : i32
    %c0_i32_2 = arith.constant 0 : i32
    return %arg0, %2, %c0_i32, %c0_i32_1 : i32, i32, i32, i32
  }
  func.func @transform_6(%arg0: i32, %arg1: i32) -> (i32, i32) {
    %c0_i32 = arith.constant 0 : i32
    %c0_i32_0 = arith.constant 0 : i32
    %c0_i32_1 = arith.constant 0 : i32
    return %c0_i32, %c0_i32_0 : i32, i32
  }
  func.func @transform_7(%arg0: i32, %arg1: i32) -> (i32, i32) {
    %c0_i32 = arith.constant 0 : i32
    %c0_i32_0 = arith.constant 0 : i32
    %c0_i32_1 = arith.constant 0 : i32
    return %c0_i32, %c0_i32_0 : i32, i32
  }
  func.func @transform_8(%arg0: i32, %arg1: i32) -> (i32, i32) {
    %c0_i32 = arith.constant 0 : i32
    %c0_i32_0 = arith.constant 0 : i32
    %c0_i32_1 = arith.constant 0 : i32
    return %c0_i32, %c0_i32_0 : i32, i32
  }
  func.func @transform_9(%arg0: i32, %arg1: i32) -> (i32, i32) {
    %c0_i32 = arith.constant 0 : i32
    %c0_i32_0 = arith.constant 0 : i32
    %c0_i32_1 = arith.constant 0 : i32
    return %c0_i32, %c0_i32_0 : i32, i32
  }
  func.func @transform_10(%arg0: i32, %arg1: i32) -> (i32, i32, i32, i32) {
    %c0_i32 = arith.constant 0 : i32
    %c0_i32_0 = arith.constant 0 : i32
    %c0_i32_1 = arith.constant 0 : i32
    return %arg0, %arg1, %c0_i32, %c0_i32_0 : i32, i32, i32, i32
  }
}

</mosaic_0001>

<bundles_post_ra>
// kernel: tpu_custom_call.1
= control target key start
LH: loop header
LB: loop body
LE: loop exit
PB: predicated region body
PF: predicated region fallthrough
CT: control target
= control target key end

     0   :  { %s2455_s0 = inlined_call_operand.hbm [shape: f32[2,8,8,32], index: 0, kind: input, shape index: {}]   ;;  %s2456_s1 = inlined_call_operand.hbm [shape: f32[2,8,8,32], index: 1, kind: input, shape index: {}]   ;;  %s2457_s2 = inlined_call_operand.hbm [shape: f32[2,8,8,8], index: 2, kind: input, shape index: {}]   ;;  %s2458_s3 = inlined_call_operand.vmem [shape: f32[2,4,8,8], index: 3, kind: input, shape index: {}]   ;;  %s2459_s4 = inlined_call_operand.hbm [shape: f32[2,4,8,8], index: 4, kind: input, shape index: {}]   ;;  %s2460_s5 = inlined_call_operand.hbm [shape: f32[2,4,8,8], index: 5, kind: input, shape index: {}]   ;;  %s2461_s6 = inlined_call_operand.vmem [shape: f32[32,8], index: 6, kind: input, shape index: {}]   ;;  %s2462_s7 = inlined_call_operand.vmem [shape: f32[16,8], index: 7, kind: input, shape index: {}]   ;;  %s2463_s8 = inlined_call_operand.vmem [shape: f32[24,8], index: 8, kind: input, shape index: {}]   ;;  %s2464_s9 = inlined_call_operand.vmem [shape: f32[1,8], index: 9, kind: input, shape index: {}]   ;;  %s2465_s10 = inlined_call_operand.hbm [shape: f32[2,8,8,8], index: 10, kind: output, shape index: {}]  }
   0x1   :  { %2480 = sst [smem:[#allocation25_spill]] %s2456_s1 }
   0x2   :  { %2481 = sst [smem:[#allocation26_spill]] %s2458_s3 }
   0x3   :  { %2482 = sst [smem:[#allocation27_spill]] %s2459_s4 }
   0x4   :  { %2483 = sst [smem:[#allocation28_spill]] %s2461_s6 }
   0x5   :  { %2484 = sst [smem:[#allocation29_spill]] %s2462_s7 }
   0x6   :  { %2485 = sst [smem:[#allocation30_spill]] %s2463_s8 }
   0x7   :  { %2486 = sst [smem:[#allocation31_spill]] %s2464_s9 }
   0x8   :  { %2487 = sst [smem:[#allocation32_spill]] %s2465_s10 }
   0x9   :  { %15 = vsyncpa [#allocation3], 0 }
   0xa   :  { %17 = vsyncpa [#allocation3 + $0x1], 0 }
   0xb   :  { %18 = vsyncpa [#allocation6], 0 }
   0xc   :  { %20 = vsyncpa [#allocation6 + $0x1], 0 }
   0xd   :  { %21 = vsyncpa [#allocation9], 0 }
   0xe   :  { %23 = vsyncpa [#allocation9 + $0x1], 0 }
   0xf   :  { %24 = vsyncpa [#allocation4], 0 }
  0x10   :  { %26 = vsyncpa [#allocation4 + $0x1], 0  ;;  %s1999_s13 = smov 0   ;;  %s2001_s14 = smov 0  }
  0x11   :  { %s2003_s15 = smov 0   ;;  %s2005_s16 = smov 0  }
  0x12   :  { %s2007_s17 = smov 0   ;;  %s2009_s18 = smov 0  }
  0x13 LB: > { %2488 = sst [smem:[#allocation16_spill]] %s1910_s13  ;;  %s2030_s19 = sadd.s32 4294967295, %s1930_s18   ;;  %s1930_s18 = sphi %s2009_s18, %s32_s18   ;;  %s1926_s17 = sphi %s2007_s17, %s2526_s17   ;;  %s1922_s16 = sphi %s2005_s16, %s2525_s16   ;;  %s1918_s15 = sphi %s2003_s15, %s2524_s15   ;;  %s1914_s14 = sphi %s2001_s14, %s2528_s14   ;;  %s1910_s13 = sphi %s1999_s13, %s2527_s13  }
  0x14   : > { %2489 = sst [smem:[#allocation17_spill]] %s1918_s15  ;;  %s1457_s20 = sadd.s32 4294967294, %s1930_s18  }
  0x15   : > { %2490 = sst [smem:[#allocation18_spill]] %s1922_s16  ;;  %s44_s21 = sadd.s32 1, %s1926_s17 }
  0x16   : > { %2491 = sst [smem:[#allocation19_spill]] %s1926_s17  ;;  %s53_s22 = sadd.s32 1, %s1918_s15 }
  0x17   : > { %2492 = sst [smem:[#allocation20_spill]] %s1930_s18  ;;  %p46_p0 = scmp.ge.s32.totalorder %s44_s21, 2 }
  0x18   : > { %p60_p1 = scmp.ne.s32.totalorder %s1918_s15, %s1914_s14  ;;  %p61_p2 = scmp.eq.s32.totalorder %s1930_s18, 0 }
  0x19   : > { %p66_p3 = scmp.ne.s32.totalorder %s1914_s14, %s1910_s13  ;;  %s2530_s21 = smov (%p46_p0, %s44_s21), 0 }
  0x1a   : > { %2493 = sst [smem:[#allocation21_spill]] %s2530_s21  ;;  %p2042_p4 = por %p61_p2, %p60_p1 }
  0x1b   : > { %p67_p5 = scmp.eq.s32.totalorder %s2030_s19, 0  ;;  %s48_s24 = ssub.s32 %s1926_s17, %s2530_s21 }
  0x1c   : > { %p340_p6 = scmp.eq.s32.totalorder %s2030_s19, 1  ;;  %p51_p7 = scmp.eq.s32.totalorder %s48_s24, 0 }
  0x1d   : > { %p2050_p8 = por %p67_p5, %p66_p3  ;;  %p346_p10 = scmp.eq.s32.totalorder %s1457_s20, 1 }
  0x1e   : > { %p2054_p9 = por %p340_p6, %p60_p1  ;;  %p1646_p13 = scmp.lt.s32.totalorder %s1930_s18, 2 }
  0x1f   : > { %s2059_s27 = scalar_select %p51_p7, %s1918_s15, %s53_s22  }
  0x20   : > { %s2496_s26 = scalar_select %p2054_p9, 1, 0 }
  0x21   : > { %2498 = sst [smem:[#allocation23_spill]] %s2059_s27  ;;  %p2061_p11 = por %p346_p10, %p66_p3 }
  0x22   : > { %2497 = sst [smem:[#allocation22_spill]] %s2496_s26  ;;  %s2068_s29 = sand.u32 1, %s1918_s15  }
  0x23   : > { %s2499_s28 = scalar_select %p2061_p11, 1, 0 }
  0x24   : > { %s2071_s30 = sshll.u32 %s1926_s17, 10  ;;  %p2080_p0 = pnand %p1646_p13, %p2042_p4 }
  0x25   : > { %2500 = sst [smem:[#allocation24_spill]] %s2499_s28  ;;  %s2085_s21 = sshll.u32 %s2068_s29, 3 }
  0x26   : > { %s2502_s1 = sld [smem:[#allocation25_spill]]  ;;  %s405_s13 = scalar_lea.vmem [#allocation5], %s2085_s21 }
  0x27   : > { %s418_s10 = sshll.u32 %s405_s13, 4  ;;  %s2503_s23 = sand.u32 1, %s1930_s18   ;;  %s419_s10 = int_to_ptr.vmem [resolvable:$true] %s418_s10 }
  0x28   : > { %s2098_s20 = scalar_lea.sflag [#allocation6], %s2503_s23  ;;  %p2102_p1 = pneg %p2080_p0 }
  0x29   : > { %s1715_s9 = scalar_lea.vmem %s419_s10, 128  ;;  %s1932_s13 = smov [#allocation5]  }
  0x2a   : > { %p1716_p2 = scmp.ne.s32.totalorder %s419_s10, %s1715_s9  ;;  %s1720_s15 = sshll.u32 %s1932_s13, 4  ;;  %s1721_s15 = int_to_ptr.vmem [resolvable:$false] %s1720_s15 }
  0x2b   : > { %s1722_s27 = scalar_lea.vmem %s1721_s15, 256  ;;  %p1723_p5 = scmp.lt.s32.totalorder %s419_s10, %s1721_s15 }
  0x2c   : > { %s416_s28 = scalar_lea.hbm %s2502_s1, %s2071_s30  ;;  %p1718_p3 = pnand %p1716_p2, %p2102_p1 }
  0x2d   : > { %p1724_p6 = scmp.lt.s32.totalorder %s1722_s27, %s1715_s9 }
  0x2e   : > { %p1719_p4 = pneg %p1718_p3 }
  0x2f   : > { %p1725_p7 = por %p1724_p6, %p1723_p5 }
  0x31   : > { %p1726_p10 = pnand %p1725_p7, %p1719_p4 }
  0x33   : > { %1729 = shalt.err (!%p1726_p10)
}
  0x34   : > { %1632 = dma.hbm_to_vmem [thread:$0]  (!%p2080_p0), %s416_s28, 128, %s419_s10, %s2098_s20  }
  0x35   : > { %p1475_p13 = scmp.ge.s32.totalorder %s1930_s18, 1  ;;  %p507_p2 = scmp.lt.s32.totalorder %s1930_s18, 3 }
  0x36   : > { %s1517_s9 = sshll.u32 %s1926_s17, 9  ;;  %s2506_s4 = sld [smem:[#allocation27_spill]] }
  0x37   : > { %p2113_p3 = pnand %p1475_p13, %p507_p2  ;;  %s465_s15 = scalar_lea.vmem [#allocation8], %s2085_s21 }
  0x38   : > { %s478_s27 = sshll.u32 %s465_s15, 4  ;;  %s2122_s12 = sadd.s32 384, %s1517_s9  ;;  %s479_s27 = int_to_ptr.vmem [resolvable:$true] %s478_s27 }
  0x39   : > { %s2507_s1 = sand.u32 1, %s1930_s18   ;;  %s1743_s10 = scalar_lea.vmem %s479_s27, 128 }
  0x3a   : > { %s2126_s3 = scalar_lea.sflag [#allocation9], %s2507_s1  ;;  %p1744_p4 = scmp.ne.s32.totalorder %s479_s27, %s1743_s10 }
  0x3b   : > { %s1933_s28 = smov [#allocation8]  }
  0x3c   : > { %s476_s13 = scalar_lea.hbm %s2506_s4, %s1517_s9  ;;  %p1746_p5 = pnand %p1744_p4, %p2102_p1 }
  0x3d   : > { %s1748_s16 = sshll.u32 %s1933_s28, 4  ;;  %s1749_s16 = int_to_ptr.vmem [resolvable:$false] %s1748_s16 }
  0x3e   : > { %p1747_p6 = pneg %p1746_p5  ;;  %s1750_s17 = scalar_lea.vmem %s1749_s16, 256 }
  0x3f   : > { %p1751_p7 = scmp.lt.s32.totalorder %s479_s27, %s1749_s16  ;;  %p1752_p10 = scmp.lt.s32.totalorder %s1750_s17, %s1743_s10 }
  0x41   : > { %p1753_p13 = por %p1752_p10, %p1751_p7 }
  0x43   : > { %p1754_p2 = pnand %p1753_p13, %p1747_p6 }
  0x45   : > { %1757 = shalt.err (!%p1754_p2)
}
  0x46   : > { %1638 = dma.hbm_to_vmem [thread:$0]  (!%p2080_p0), %s476_s13, 128, %s479_s27, %s2126_s3  }
  0x47   : > { %s1460_s1 = sshll.u32 %s2068_s29, 6  ;;  %s379_s23 = scalar_lea.sflag [#allocation3], %s2068_s29 }
  0x48   : > { %s382_s9 = scalar_lea.vmem [#allocation2], %s1460_s1  ;;  %s1934_s16 = smov [#allocation2]  }
  0x49   : > { %s391_s11 = sshll.u32 %s382_s9, 4  ;;  %s1776_s17 = sshll.u32 %s1934_s16, 4  ;;  %s392_s11 = int_to_ptr.vmem [resolvable:$true] %s391_s11  ;;  %s1777_s17 = int_to_ptr.vmem [resolvable:$false] %s1776_s17 }
  0x4a   : > { %s1771_s15 = scalar_lea.vmem %s392_s11, 1024  ;;  %s1778_s10 = scalar_lea.vmem %s1777_s17, 2048 }
  0x4b   : > { %p1772_p4 = scmp.ne.s32.totalorder %s392_s11, %s1771_s15  ;;  %p1779_p6 = scmp.lt.s32.totalorder %s392_s11, %s1777_s17 }
  0x4c   : > { %p1780_p7 = scmp.lt.s32.totalorder %s1778_s10, %s1771_s15 }
  0x4d   : > { %p1774_p5 = pnand %p1772_p4, %p2102_p1 }
  0x4e   : > { %p1781_p10 = por %p1780_p7, %p1779_p6 }
  0x4f   : > { %p1775_p12 = pneg %p1774_p5 }
  0x51   : > { %p1782_p13 = pnand %p1781_p10, %p1775_p12 }
  0x53   : > { %1785 = shalt.err (!%p1782_p13)
}
  0x54   : > { %s1935_s13 = smov 128   ;;  %s1936_s29 = smov 8  }
  0x55   : > { %s2508_s9 = scalar_lea.hbm %s2455_s0, %s2071_s30  ;;  %s429_s16 = scalar_lea.vmem [#allocation7], %s1460_s1 }
  0x56   : > { %1629 = dma.hbm_to_vmem [thread:$0]  (!%p2080_p0), %s2508_s9, 1024, %s392_s11, %s379_s23, %s1935_s13, %s1935_s13, %s1936_s29  }
  0x57   : > { %s438_s4 = sshll.u32 %s429_s16, 4  ;;  %s500_s10 = scalar_lea.hbm %s2460_s5, %s2122_s12  ;;  %s439_s4 = int_to_ptr.vmem [resolvable:$true] %s438_s4 }
  0x58   : > { %s1799_s18 = scalar_lea.vmem %s439_s4, 1024  ;;  %s1937_s8 = smov [#allocation7]  }
  0x59   : > { %p1800_p12 = scmp.ne.s32.totalorder %s439_s4, %s1799_s18  ;;  %s1804_s6 = sshll.u32 %s1937_s8, 4  ;;  %s1805_s6 = int_to_ptr.vmem [resolvable:$false] %s1804_s6 }
  0x5a   : > { %s1806_s7 = scalar_lea.vmem %s1805_s6, 2048  ;;  %p1807_p5 = scmp.lt.s32.totalorder %s439_s4, %s1805_s6 }
  0x5b   : > { %p1802_p2 = pnand %p1800_p12, %p2102_p1  ;;  %p1808_p6 = scmp.lt.s32.totalorder %s1806_s7, %s1799_s18 }
  0x5d   : > { %p1803_p4 = pneg %p1802_p2  ;;  %p1809_p7 = por %p1808_p6, %p1807_p5 }
  0x5f   : > { %p1810_p10 = pnand %p1809_p7, %p1803_p4 }
  0x61   : > { %1813 = shalt.err (!%p1810_p10)
}
  0x62   : > { %s2509_s23 = scalar_lea.hbm %s2457_s2, %s2071_s30  ;;  %s489_s27 = scalar_lea.vmem [#allocation10], %s2085_s21 }
  0x63   : > { %1635 = dma.hbm_to_vmem [thread:$0]  (!%p2080_p0), %s2509_s23, 1024, %s439_s4, %s2098_s20, %s1935_s13, %s1935_s13, %s1936_s29  }
  0x64   : > { %s502_s8 = sshll.u32 %s489_s27, 4  ;;  %s1938_s6 = smov [#allocation10]   ;;  %s503_s8 = int_to_ptr.vmem [resolvable:$true] %s502_s8 }
  0x65   : > { %s1827_s28 = scalar_lea.vmem %s503_s8, 128  ;;  %s1832_s7 = sshll.u32 %s1938_s6, 4  ;;  %s1833_s7 = int_to_ptr.vmem [resolvable:$false] %s1832_s7 }
  0x66   : > { %p1828_p13 = scmp.ne.s32.totalorder %s503_s8, %s1827_s28  ;;  %s1834_s18 = scalar_lea.vmem %s1833_s7, 256 }
  0x67   : > { %p1835_p4 = scmp.lt.s32.totalorder %s503_s8, %s1833_s7  ;;  %p1836_p5 = scmp.lt.s32.totalorder %s1834_s18, %s1827_s28 }
  0x68   : > { %p1830_p12 = pnand %p1828_p13, %p2102_p1 }
  0x69   : > { %p1837_p6 = por %p1836_p5, %p1835_p4 }
  0x6a   : > { %p1831_p2 = pneg %p1830_p12 }
  0x6c   : > { %p1838_p7 = pnand %p1837_p6, %p1831_p2 }
  0x6e   : > { %1841 = shalt.err (!%p1838_p7)
}
  0x6f   : > { %1641 = dma.hbm_to_vmem [thread:$0]  (!%p2080_p0), %s500_s10, 128, %s503_s8, %s2126_s3  }
  0x70   : > { %511 = sbr.rel (%p2113_p3) target bundleno = 498 (0x1f2), region = 60  ;;  %s2172_s30 = sand.u32 (!%p2113_p3), 1, %s1914_s14  }
  0x71   : > { %s2175_s22 = sshll.u32 (!%p2113_p3), %s2172_s30, 6  ;;  %s514_s24 = scalar_lea.sflag (!%p2113_p3), [#allocation3], %s2172_s30 }
  0x72   : > { %s2179_s20 = scalar_lea.vmem (!%p2113_p3), [#allocation2], %s2175_s22 }
  0x75   : > { %1893 = dma.done.wait (%p2050_p8), %s514_s24, 1024  }
  0x76   : > { %1895 = vsyncadd (%p2050_p8), %s514_s24, 4294966272  ;;  %s522_s3 = sand.u32 1, %s2030_s19   ;;  %s2187_s12 = sshll.u32 %s2172_s30, 3 }
  0x77   : > { %s523_s26 = scalar_lea.sflag [#allocation6], %s522_s3  ;;  %s526_s13 = scalar_lea.vmem [#allocation5], %s2187_s12 }
  0x78   : > { %1897 = dma.done.wait (%p2050_p8), %s523_s26, 1152  }
  0x79   : > { %1899 = vsyncadd (%p2050_p8), %s523_s26, 4294966144  ;;  %s2195_s29 = scalar_lea.vmem [#allocation7], %s2175_s22  ;;  %s541_s9 = scalar_lea.sflag [#allocation9], %s522_s3 }
  0x7a   : > { %s544_s16 = scalar_lea.vmem [#allocation8], %s2187_s12 }
  0x7b   : > { %1901 = dma.done.wait (%p2050_p8), %s541_s9, 256  }
  0x7c   : > { %1903 = vsyncadd (%p2050_p8), %s541_s9, 4294967040  ;;  %v2203_v0 = vld [vmem:[%s2179_s20 + $0x18] sm:$0xff]  ;;  %v2206_v1 = vld [vmem:[%s2179_s20] sm:$0xff]  ;;  %s1939_s19 = smov 112   ;;  %s2510_s15 = sld [smem:[#allocation29_spill]]  ;;  %vm688_vm0 = vcmask 130048  }
  0x7d   : > { %680 = vrot.lane.b32.xlu0 %v2203_v0, %s1939_s19  ;;  %674 = vrot.lane.b32.xlu1 %v2206_v1, %s1939_s19  ;;  %v2213_v2 = vld [vmem:[%s2179_s20 + $0x20] sm:$0xff]  ;;  %v2216_v3 = vld [vmem:[%s2179_s20 + $0x30] sm:$0xff]  ;;  %s2512_s8 = sld [smem:[#allocation28_spill]]  ;;  %s1940_s18 = smov 120   ;;  %vm810_vm1 = vcmask 261120   ;;  %vm970_vm2 = vcmask 64512  }
  0x7e   : > { %v659_v4 = vld [vmem:[%s526_s13] sm:$0xff]  ;;  %s2513_s7 = sld [smem:[#allocation30_spill]]  ;;  %v646_v12 = vld [vmem:[%s2179_s20 + $0x10] sm:$0xff]  ;;  %v2250_v13 = vld [vmem:[%s2179_s20 + $0x38] sm:$0xff]  ;;  %vm1011_vm3 = vcmask 1040384   ;;  %vm1023_vm4 = vcmask 195584  }
  0x7f   : > { %v661_v7 = vmul.f32 0.0, %v659_v4  ;;  %v2229_v8 = vld [vmem:[%s2179_s20 + $0x28] sm:$0xff]  ;;  %s2514_s17 = sld [smem:[#allocation18_spill]]  ;;  %s553_s21 = scalar_lea.vmem [#allocation10], %s2187_s12 }
  0x80   : > { %v645_v11 = vld [vmem:[%s2179_s20 + $0x8] sm:$0xff]  ;;  %s2515_s27 = sld [smem:[#allocation26_spill]] }
  0x81   : > { %682 = vrot.lane.b32.xlu0 %v2213_v2, %s1939_s19  ;;  %686 = vrot.lane.b32.xlu1 %v2216_v3, %s1939_s19  ;;  %s2516_s4 = sld [smem:[#allocation31_spill]] }
  0x82   : > { %s2511_s10 = smov %s2510_s15  ;;  %v663_v5 = vld [vmem:[%s2510_s15 + $0x8] sm:$0xff]  ;;  %s2518_s26 = sld [smem:[#allocation32_spill]] }
  0x83   : > { %1610 = vmatprep.subr.mxu1 %v663_v5  ;;  %v662_v6 = vld [vmem:[%s2511_s10] sm:$0xff]  ;;  %1556 = vmatprep.subr.mxu0 %v663_v5  ;;  %v655_v9 = vld [vmem:[%s2512_s8 + $0x18] sm:$0xff]  ;;  %v654_v18 = vld [vmem:[%s2512_s8 + $0x10] sm:$0xff] }
  0x84   : > { %1612 = vmatpush3.msra.mxu1 %v663_v5  ;;  %1557 = vmatpush3.msra.mxu0 %v663_v5  ;;  %v1022_v10 = vld [vmem:[%s2513_s7 + $0x10] sm:$0xff]  ;;  %v653_v21 = vld [vmem:[%s2512_s8 + $0x8] sm:$0xff]  ;;  %v652_v22 = vld [vmem:[%s2512_s8] sm:$0xff] }
  0x85   : > { %1611 = vmatprep.subr.mxu1 %v662_v6  ;;  %1558 = vmatprep.subr.mxu0 %v662_v6  ;;  %v1021_v23 = vld [vmem:[%s2513_s7 + $0x8] sm:$0xff]  ;;  %v1020_v26 = vld [vmem:[%s2513_s7] sm:$0xff]  ;;  %p626_p8 = scmp.lt.s32.totalorder %s2514_s17, 1  ;;  %s1521_s12 = sshll.u32 %s2514_s17, 10 }
  0x86   : > { %1613 = vmatpush3.msra.mxu1 %v662_v6  ;;  %1559 = vmatpush3.msra.mxu0 %v662_v6 }
  0x87   : > { %684 = vrot.lane.b32.xlu0 %v2229_v8, %s1939_s19  ;;  %672 = vrot.lane.b32.xlu1 %v661_v7, %s1939_s19  ;;  %s627_s15 = scalar_select %p626_p8, %s2514_s17, 1 }
  0x88   : > { %1572 = vmatprep.subr.mxu1 %v655_v9  ;;  %1592 = vmatprep.subr.mxu0 %v1022_v10  ;;  %s2401_s13 = scalar_lea.hbm %s2518_s26, %s1521_s12 }
  0x89   : > { %s1520_s1 = sshll.u32 %s627_s15, 5 }
  0x8a   : > { %s2345_s28 = scalar_lea.vmem %s2515_s27, %s1520_s1 }
  0x8b   : > { %933 = vrot.lane.b32.xlu0 %v2206_v1, %s1940_s18  ;;  %676 = vrot.lane.b32.xlu1 %v645_v11, %s1939_s19 }
  0x8f   : > { %935 = vrot.lane.b32.xlu0 %v645_v11, %s1940_s18  ;;  %967 = vrot.lane.b32.xlu1 %v661_v7, %s1940_s18 }
  0x93   : > { %678 = vrot.lane.b32.xlu0 %v646_v12, %s1939_s19  ;;  %937 = vrot.lane.b32.xlu1 %v646_v12, %s1940_s18 }
  0x97   : > { %939 = vrot.lane.b32.xlu0 %v2203_v0, %s1940_s18  ;;  %941 = vrot.lane.b32.xlu1 %v2213_v2, %s1940_s18 }
  0x9b   : > { %943 = vrot.lane.b32.xlu0 %v2229_v8, %s1940_s18  ;;  %945 = vrot.lane.b32.xlu1 %v2216_v3, %s1940_s18 }
  0x9f   : > { %947 = vrot.lane.b32.xlu0 %v2250_v13, %s1940_s18  ;;  %957 = vrot.lane.b32.xlu1 %v2250_v13, %s1939_s19  ;;  %s1941_s19 = smov [#allocation11]  }
  0xa0   : > { %s1846_s25 = sshll.u32 %s1941_s19, 4  ;;  %s1847_s25 = int_to_ptr.vmem [resolvable:$false] %s1846_s25 }
  0xa1   : > { %s1848_s17 = scalar_lea.vmem %s1847_s25, 2048 }
  0xef   : > { %v2255_v14 = vpop.permute.xlu0 %680  ;;  %v675_v15 = vpop.permute.xlu1 %674 }
  0xf0   : > { %1566 = vmatprep.mubr.msk.f32.mxu1 %vm688_vm0, %v2255_v14 }
  0xf3   : > { %v683_v16 = vpop.permute.xlu0 %682  ;;  %v2259_v17 = vpop.permute.xlu1 %686 }
  0xf4   : > { %1567 = vmatmul.mubr.msk.f32.vlgmr.msra.gmra.mxu1 %vm688_vm0, %v683_v16 }
  0xf5   : > { %1573 = vmatpush3.msra.mxu1 %v655_v9 }
  0xf6   : > { %1574 = vmatprep.subr.mxu1 %v654_v18 }
  0xf7   : > { %1575 = vmatpush3.msra.mxu1 %v654_v18  ;;  %v1184_v18 = vld [vmem:[%s2345_s28] sm:$0xff] }
  0xf8   : > { %1576 = vmatprep.subr.mxu1 %v653_v21 }
  0xf9   : > { %v2265_v19 = vpop.permute.xlu0 %684  ;;  %v673_v20 = vpop.permute.xlu1 %672  ;;  %1577 = vmatpush3.msra.mxu1 %v653_v21 }
  0xfa   : > { %1560 = vmatprep.mubr.msk.f32.mxu0 %vm688_vm0, %v673_v20  ;;  %1569 = vmatprep.mubr.msk.f32.mxu1 %vm688_vm0, %v2265_v19 }
  0xfb   : > { %1561 = vmatmul.mubr.msk.f32.vlgmr.msra.gmra.mxu0 %vm688_vm0, %v675_v15  ;;  %1570 = vmatmul.mubr.msk.f32.gmra.mxu1 %vm688_vm0, %v2259_v17 }
  0xfc   : > { %1580 = vmatprep.mubr.msk.f32.mxu1 %vm810_vm1, %v2206_v1  ;;  %1593 = vmatpush3.msra.mxu0 %v1022_v10 }
  0xfd   : > { %v934_v24 = vpop.permute.xlu0 %933  ;;  %v677_v25 = vpop.permute.xlu1 %676  ;;  %1578 = vmatprep.subr.mxu1 %v652_v22  ;;  %1594 = vmatprep.subr.mxu0 %v1021_v23 }
  0xfe   : > { %1563 = vmatprep.mubr.msk.f32.mxu0 %vm688_vm0, %v677_v25  ;;  %1579 = vmatpush3.msra.mxu1 %v652_v22  ;;  %v971_v27 = vsel %vm970_vm2, %v934_v24, %v675_v15  ;;  %v2352_v22 = vld [vmem:[%s2516_s4] ss:$0 sm:$0xff] }
  0xff   : > { %1581 = vmatmul.mubr.msk.f32.vlgmr.msra.gmra.mxu1 %vm810_vm1, %v645_v11  ;;  %1595 = vmatpush3.msra.mxu0 %v1021_v23  ;;  %v1188_v23 = vld [vmem:[%s544_s16] sm:$0xff]  ;;  %s2369_s16 = scalar_lea.vmem [#allocation11], %s2175_s22 }
 0x100   : > { %1583 = vmatprep.mubr.msk.f32.mxu1 %vm810_vm1, %v646_v12  ;;  %1596 = vmatprep.subr.mxu0 %v1020_v26  ;;  %s1256_s24 = sshll.u32 %s2369_s16, 4  ;;  %s2403_s24 = int_to_ptr.vmem [resolvable:$true] %s1256_s24 }
 0x101   : > { %v936_v28 = vpop.permute.xlu0 %935  ;;  %v968_v29 = vpop.permute.xlu1 %967  ;;  %1597 = vmatpush3.msra.mxu0 %v1020_v26  ;;  %v1190_v26 = vmul.f32 0.75, %v1184_v18  ;;  %s1842_s9 = scalar_lea.vmem %s2403_s24, 1024  ;;  %p1849_p10 = scmp.lt.s32.totalorder %s2403_s24, %s1847_s25 }
 0x102   : > { %v972_v30 = vsel %vm970_vm2, %v936_v28, %v677_v25  ;;  %v979_v31 = vsel %vm688_vm0, %v971_v27, %v968_v29  ;;  %p1843_p0 = scmp.ne.s32.totalorder %s2403_s24, %s1842_s9  ;;  %p1850_p13 = scmp.lt.s32.totalorder %s1848_s17, %s1842_s9 }
 0x103   : > { %v980_v32 = vsel %vm688_vm0, %v972_v30, %v934_v24  ;;  %v995_v33 = vrot.slane %v979_v31, 7  ;;  %1584 = vmatmul.mubr.msk.f32.gmra.mxu1 %vm810_vm1, %v2203_v0 }
 0x104   : > { %v996_v34 = vrot.slane %v980_v32, 7  ;;  %1586 = vmatprep.mubr.msk.f32.mxu1 %vm810_vm1, %v2213_v2  ;;  %p1844_p1 = pnand %p1843_p0, %p2054_p9  ;;  %p1851_p12 = por %p1850_p13, %p1849_p10 }
 0x105   : > { %v679_v35 = vpop.permute.xlu0 %678  ;;  %v938_v36 = vpop.permute.xlu1 %937  ;;  %v1012_v37 = vsel %vm1011_vm3, 0.0, %v995_v33  ;;  %v1194_v33 = vmul.f32 0.25, %v1188_v23 }
 0x106   : > { %v973_v38 = vsel %vm970_vm2, %v938_v36, %v679_v35  ;;  %1564 = vmatmul.mubr.msk.f32.gmra.mxu0 %vm688_vm0, %v679_v35  ;;  %v1013_v41 = vsel %vm1011_vm3, 0.0, %v996_v34  ;;  %v1209_v35 = vld [vmem:[%s2195_s29 + $0x8] sm:$0xff]  ;;  %p1845_p3 = pneg %p1844_p1 }
 0x107   : > { %v981_v39 = vsel %vm688_vm0, %v973_v38, %v936_v28  ;;  %1598 = vmatprep.mubr.msk.f32.mxu0 %vm1023_vm4, %v1012_v37  ;;  %1587 = vmatmul.mubr.msk.f32.gmra.mxu1 %vm810_vm1, %v2229_v8  ;;  %v1186_v28 = vld [vmem:[%s2345_s28 + $0x10] sm:$0xff] }
 0x108   : > { %v997_v40 = vrot.slane %v981_v39, 7  ;;  %1589 = vmatprep.mubr.msk.f32.mxu1 %vm810_vm1, %v2216_v3  ;;  %v2359_v37 = vmul.f32 0.25, %v1186_v28  ;;  %p1852_p2 = pnand %p1851_p12, %p1845_p3 }
 0x109   : > { %v940_v42 = vpop.permute.xlu0 %939  ;;  %v942_v43 = vpop.permute.xlu1 %941 }
 0x10a   : > { %v974_v44 = vsel %vm970_vm2, %v940_v42, %v2255_v14  ;;  %v975_v45 = vsel %vm970_vm2, %v942_v43, %v683_v16  ;;  %1599 = vmatmul.mubr.msk.f32.vlgmr.msra.gmra.mxu0 %vm1023_vm4, %v1013_v41  ;;  %v1014_v46 = vsel %vm1011_vm3, 0.0, %v997_v40 }
 0x10b   : > { %v982_v47 = vsel %vm688_vm0, %v974_v44, %v938_v36  ;;  %v983_v48 = vsel %vm688_vm0, %v975_v45, %v940_v42  ;;  %1601 = vmatprep.mubr.msk.f32.mxu0 %vm1023_vm4, %v1014_v46  ;;  %1590 = vmatmul.mubr.msk.f32.gmra.mxu1 %vm810_vm1, %v2250_v13  ;;  %v1208_v44 = vld [vmem:[%s2195_s29] sm:$0xff]  ;;  %v1187_v46 = vld [vmem:[%s2345_s28 + $0x18] sm:$0xff] }
 0x10c   : > { %v998_v49 = vrot.slane %v982_v47, 7  ;;  %v999_v50 = vrot.slane %v983_v48, 7 }
 0x10d   : > { %v944_v51 = vpop.permute.xlu0 %943  ;;  %v946_v52 = vpop.permute.xlu1 %945 }
 0x10e   : > { %v976_v53 = vsel %vm970_vm2, %v944_v51, %v2265_v19  ;;  %v977_v54 = vsel %vm970_vm2, %v946_v52, %v2259_v17  ;;  %v1015_v55 = vsel %vm1011_vm3, 0.0, %v998_v49  ;;  %v1016_v56 = vsel %vm1011_vm3, 0.0, %v999_v50  ;;  %v1185_v19 = vld [vmem:[%s2345_s28 + $0x8] sm:$0xff] }
 0x10f   : > { %v984_v57 = vsel %vm688_vm0, %v976_v53, %v942_v43  ;;  %v985_v58 = vsel %vm688_vm0, %v977_v54, %v944_v51  ;;  %1602 = vmatmul.mubr.msk.f32.gmra.mxu0 %vm1023_vm4, %v1015_v55  ;;  %v1196_v27 = vmul.f32 0.25, %v1185_v19  ;;  %v1191_v36 = vmul.f32 0.75, %v1185_v19 }
 0x110   : > { %v1000_v59 = vrot.slane %v984_v57, 7  ;;  %v1001_v60 = vrot.slane %v985_v58, 7  ;;  %1604 = vmatprep.mubr.msk.f32.mxu0 %vm1023_vm4, %v1016_v56  ;;  %v1198_v49 = vadd.f32 %v1194_v33, %v1190_v26  ;;  %v1195_v51 = vmul.f32 0.25, %v1184_v18  ;;  %v1211_v58 = vld [vmem:[%s2195_s29 + $0x18] sm:$0xff] }
 0x111   : > { %v948_v61 = vpop.permute.xlu0 %947  ;;  %v958_v62 = vpop.permute.xlu1 %957  ;;  %v1204_v39 = vadd.f32 %v1196_v27, %v1190_v26  ;;  %v1205_v54 = vadd.f32 %v2359_v37, %v1191_v36 }
 0x112   : > { %v978_v63 = vsel %vm970_vm2, %v948_v61, %v958_v62  ;;  %v1017_v0 = vsel %vm1011_vm3, 0.0, %v1000_v59  ;;  %v1018_v1 = vsel %vm1011_vm3, 0.0, %v1001_v60  ;;  %v1192_v60 = vmul.f32 0.75, %v1186_v28 }
 0x113   : > { %v986_v2 = vsel %vm688_vm0, %v978_v63, %v946_v52  ;;  %1605 = vmatmul.mubr.msk.f32.gmra.mxu0 %vm1023_vm4, %v1017_v0  ;;  %v1202_v61 = vmul.f32 0.25, %v1187_v46  ;;  %v1193_v28 = vmul.f32 0.75, %v1187_v46 }
 0x114   : > { %v1002_v3 = vrot.slane %v986_v2, 7  ;;  %1607 = vmatprep.mubr.msk.f32.mxu0 %vm1023_vm4, %v1018_v1 }
 0x116   : > { %v1019_v4 = vsel %vm1011_vm3, 0.0, %v1002_v3 }
 0x117   : > { %1608 = vmatmul.mubr.msk.f32.gmra.mxu0 %vm1023_vm4, %v1019_v4  ;;  %v1199_v4 = vadd.f32 %v1195_v51, %v1191_v36 }
 0x1b4   : > { %v1568_v5 = vpop.f32.mrf.mxu1 }
 0x1b6   : > { %v791_v6 = vpop.f32.mrf.mxu1 }
 0x1bb   : > { %v2337_v7 = vpop.f32.mrf.mxu1  ;;  %v1562_v9 = vpop.f32.mrf.mxu0 }
 0x1bd   : > { %v2339_v8 = vpop.f32.mrf.mxu1  ;;  %v771_v12 = vpop.f32.mrf.mxu0 }
 0x1bf   : > { %v1582_v10 = vpop.f32.mrf.mxu1 }
 0x1c0   : > { %v900_v20 = vadd.f32 %v1582_v10, %v1562_v9 }
 0x1c1   : > { %v894_v11 = vpop.f32.mrf.mxu1 }
 0x1c2   : > { %v895_v24 = vadd.f32 %v894_v11, %v771_v12 }
 0x1c3   : > { %v1585_v13 = vpop.f32.mrf.mxu1 }
 0x1c5   : > { %v904_v14 = vpop.f32.mrf.mxu1 }
 0x1c6   : > { %v1565_v15 = vpop.f32.mrf.mxu0 }
 0x1c7   : > { %v1588_v16 = vpop.f32.mrf.mxu1  ;;  %v910_v34 = vadd.f32 %v1585_v13, %v1565_v15  ;;  %v1189_v13 = vld [vmem:[%s553_s21] sm:$0xff] }
 0x1c8   : > { %v781_v17 = vpop.f32.mrf.mxu0  ;;  %v920_v52 = vadd.f32 %v1588_v16, %v1568_v5  ;;  %v1210_v5 = vld [vmem:[%s2195_s29 + $0x10] sm:$0xff]  ;;  %v1206_v16 = vadd.f32 %v1202_v61, %v1192_v60 }
 0x1c9   : > { %v914_v29 = vpop.f32.mrf.mxu1  ;;  %v905_v42 = vadd.f32 %v904_v14, %v781_v17  ;;  %v1213_v17 = vld [vmem:[%s2195_s29 + $0x28] sm:$0xff] }
 0x1ca   : > { %v1600_v21 = vpop.f32.mrf.mxu0  ;;  %v915_v62 = vadd.f32 %v914_v29, %v791_v6 }
 0x1cb   : > { %v1154_v25 = vadd.f32 %v1600_v21, %v900_v20  ;;  %v1591_v43 = vpop.f32.mrf.mxu1 }
 0x1cc   : > { %v1114_v30 = vpop.f32.mrf.mxu0  ;;  %v930_v14 = vadd.f32 %v1591_v43, %v2337_v7  ;;  %v1203_v7 = vmul.f32 0.25, %v1189_v13  ;;  %v1201_v43 = vadd.f32 %v2359_v37, %v1193_v28 }
 0x1cd   : > { %v1169_v31 = vadd.f32 %v2352_v22, %v1154_v25  ;;  %v1153_v32 = vadd.f32 %v1114_v30, %v895_v24  ;;  %v924_v63 = vpop.f32.mrf.mxu1  ;;  %v1200_v24 = vadd.f32 %v1196_v27, %v1192_v60  ;;  %v1212_v25 = vld [vmem:[%s2195_s29 + $0x20] sm:$0xff] }
 0x1ce   : > { %v925_v15 = vadd.f32 %v924_v63, %v2339_v8 }
 0x1cf   : > { %v1177_v38 = vmax.f32 %v1169_v31, 0.0  ;;  %v1168_v40 = vadd.f32 %v2352_v22, %v1153_v32  ;;  %v1603_v41 = vpop.f32.mrf.mxu0 }
 0x1d0   : > { %v1156_v45 = vadd.f32 %v1603_v41, %v910_v34 }
 0x1d1   : > { %v1217_v47 = vadd.f32 %v1209_v35, %v1177_v38  ;;  %v1176_v48 = vmax.f32 %v1168_v40, 0.0  ;;  %v1124_v50 = vpop.f32.mrf.mxu0  ;;  %v1215_v35 = vld [vmem:[%s2195_s29 + $0x38] sm:$0xff]  ;;  %v1214_v40 = vld [vmem:[%s2195_s29 + $0x30] sm:$0xff]  ;;  %s1241_s29 = scalar_lea.sflag [#allocation4], %s2172_s30 }
 0x1d2   : > { %v1171_v53 = vadd.f32 %v2352_v22, %v1156_v45  ;;  %v1155_v55 = vadd.f32 %v1124_v50, %v905_v42 }
 0x1d3   : > { %v1225_v56 = vadd.f32 %v1217_v47, %v1204_v39  ;;  %v1216_v57 = vadd.f32 %v1208_v44, %v1176_v48  ;;  %v1606_v59 = vpop.f32.mrf.mxu0  ;;  %v1207_v39 = vadd.f32 %v1203_v7, %v1193_v28 }
 0x1d4   : > { %v1179_v0 = vmax.f32 %v1171_v53, 0.0  ;;  %v1170_v1 = vadd.f32 %v2352_v22, %v1155_v55  ;;  %v1158_v2 = vadd.f32 %v1606_v59, %v920_v52 }
 0x1d5   : > { %1233 = vst.msk [vmem:[%s2369_s16 + $0x8] sm:$0xff] %vm970_vm2, %v1225_v56  ;;  %v1224_v3 = vadd.f32 %v1216_v57, %v1198_v49  ;;  %v1134_v9 = vpop.f32.mrf.mxu0 }
 0x1d6   : > { %v1219_v10 = vadd.f32 %v1211_v58, %v1179_v0  ;;  %v1178_v11 = vmax.f32 %v1170_v1, 0.0  ;;  %v1173_v6 = vadd.f32 %v2352_v22, %v1158_v2  ;;  %v1157_v12 = vadd.f32 %v1134_v9, %v915_v62 }
 0x1d7   : > { %1232 = vst.msk [vmem:[%s2369_s16] sm:$0xff] %vm970_vm2, %v1224_v3  ;;  %v1609_v18 = vpop.f32.mrf.mxu0 }
 0x1d8   : > { %v1227_v19 = vadd.f32 %v1219_v10, %v1205_v54  ;;  %v1218_v20 = vadd.f32 %v1210_v5, %v1178_v11  ;;  %v1181_v21 = vmax.f32 %v1173_v6, 0.0  ;;  %v1172_v23 = vadd.f32 %v2352_v22, %v1157_v12 }
 0x1d9   : > { %v1160_v26 = vadd.f32 %v1609_v18, %v930_v14  ;;  %v1144_v29 = vpop.f32.mrf.mxu0 }
 0x1da   : > { %1235 = vst.msk [vmem:[%s2369_s16 + $0x18] sm:$0xff] %vm970_vm2, %v1227_v19  ;;  %v1226_v8 = vadd.f32 %v1218_v20, %v1199_v4  ;;  %v1221_v30 = vadd.f32 %v1213_v17, %v1181_v21  ;;  %v1180_v31 = vmax.f32 %v1172_v23, 0.0  ;;  %v1159_v32 = vadd.f32 %v1144_v29, %v925_v15 }
 0x1db   : > { %v1175_v33 = vadd.f32 %v2352_v22, %v1160_v26 }
 0x1dc   : > { %1234 = vst.msk [vmem:[%s2369_s16 + $0x10] sm:$0xff] %vm970_vm2, %v1226_v8  ;;  %v1229_v27 = vadd.f32 %v1221_v30, %v1206_v16  ;;  %v1220_v34 = vadd.f32 %v1212_v25, %v1180_v31  ;;  %v1174_v36 = vadd.f32 %v2352_v22, %v1159_v32 }
 0x1dd   : > { %v1183_v38 = vmax.f32 %v1175_v33, 0.0 }
 0x1de   : > { %1237 = vst.msk [vmem:[%s2369_s16 + $0x28] sm:$0xff] %vm970_vm2, %v1229_v27  ;;  %v1228_v41 = vadd.f32 %v1220_v34, %v1200_v24  ;;  %v1182_v42 = vmax.f32 %v1174_v36, 0.0 }
 0x1df   : > { %v1223_v44 = vadd.f32 %v1215_v35, %v1183_v38 }
 0x1e0   : > { %1236 = vst.msk [vmem:[%s2369_s16 + $0x20] sm:$0xff] %vm970_vm2, %v1228_v41  ;;  %v1222_v45 = vadd.f32 %v1214_v40, %v1182_v42 }
 0x1e1   : > { %v1231_v22 = vadd.f32 %v1223_v44, %v1207_v39 }
 0x1e2   : > { %v1230_v46 = vadd.f32 %v1222_v45, %v1201_v43 }
 0x1e3   : > { %1239 = vst.msk [vmem:[%s2369_s16 + $0x38] sm:$0xff] %vm970_vm2, %v1231_v22 }
 0x1e4   : > { %1238 = vst.msk [vmem:[%s2369_s16 + $0x30] sm:$0xff] %vm970_vm2, %v1230_v46 }
 0x1e5   : > { %1855 = shalt.err (!%p1852_p2)
}
 0x1e6   : > { %s1856_s15 = scalar_lea.hbm %s2401_s13, 1024  ;;  %s1860_s23 = scalar_lea.hbm %s2518_s26, 2048 }
 0x1e7   : > { %p1857_p4 = scmp.ne.s32.totalorder %s2401_s13, %s1856_s15  ;;  %p1861_p7 = scmp.lt.s32.totalorder %s2401_s13, %s2518_s26 }
 0x1e8   : > { %p1862_p8 = scmp.lt.s32.totalorder %s1860_s23, %s1856_s15 }
 0x1e9   : > { %p1858_p5 = pnand %p1857_p4, %p2054_p9 }
 0x1ea   : > { %p1863_p0 = por %p1862_p8, %p1861_p7 }
 0x1eb   : > { %p1859_p6 = pneg %p1858_p5 }
 0x1ed   : > { %p1864_p1 = pnand %p1863_p0, %p1859_p6 }
 0x1ef   : > { %1867 = shalt.err (!%p1864_p1)
}
 0x1f0   : > { %s1942_s6 = smov 128   ;;  %s1943_s18 = smov 8  }
 0x1f1   : > { %1624 = dma.vmem_to_hbm [thread:$0]  (%p2054_p9), %s2403_s24, 1024, %s2401_s13, %s1241_s29, %s1942_s6, %s1942_s6, %s1943_s18  }
 0x1f2 PF: > { %s2519_s4 = sld [smem:[#allocation16_spill]] }
 0x1f3   : > { %s2521_s21 = sld [smem:[#allocation20_spill]] }
 0x1f8   : > { %s1271_s12 = sand.u32 1, %s2519_s4  }
 0x1f9   : > { %p2522_p3 = scmp.ge.s32.totalorder %s2521_s21, 2  ;;  %s1272_s20 = scalar_lea.sflag [#allocation4], %s1271_s12 }
 0x1fb   : > { %p1643_p10 = pnand %p2522_p3, %p2061_p11 }
 0x1fd   : > { %p1644_p13 = pneg %p1643_p10 }
 0x1ff   : > { %1905 = dma.done.wait (%p1644_p13), %s1272_s20, 1024  }
 0x200   : > { %1907 = vsyncadd (%p1644_p13), %s1272_s20, 4294966272  ;;  %s32_s18 = sadd.s32 1, %s2521_s21   ;;  %s2523_s3 = sld [smem:[#allocation17_spill]] }
 0x201   : > { %p29_p12 = scmp.ge.s32.totalorder %s32_s18, 4   ;;  %s2524_s15 = sld [smem:[#allocation23_spill]] }
 0x202   : > { %s2525_s16 = sld [smem:[#allocation19_spill]]  ;;  %s2527_s13 = smov %s1914_s14 }
 0x203   : > { %s2526_s17 = sld [smem:[#allocation21_spill]]  ;;  %31 = sbr.rel (!%p29_p12) target bundleno = 19 (0x13), region = 156 }
 0x206   : > { %s2528_s14 = smov %s2523_s3 }
 0x208   :  { %1277 = vsyncpa [#allocation3], 1 }
 0x209   :  { %1279 = vsyncpa [#allocation3 + $0x1], 1 }
 0x20a   :  { %1280 = vsyncpa [#allocation6], 1 }
 0x20b   :  { %1282 = vsyncpa [#allocation6 + $0x1], 1 }
 0x20c   :  { %1283 = vsyncpa [#allocation9], 1 }
 0x20d   :  { %1285 = vsyncpa [#allocation9 + $0x1], 1 }
 0x20e   :  { %1286 = vsyncpa [#allocation4], 1 }
 0x20f   :  { %1288 = vsyncpa [#allocation4 + $0x1], 1 }

</bundles_post_ra>
